<compile_context>
chip_gen: v5e
topology: v5e:2x2
jax: 0.10.0
libtpu: 0.0.40
codegen_flags: <defaults>
</compile_context>

<pallas_src>
import functools

import jax
import jax.numpy as jnp
from jax import lax
from jax.experimental import pallas as pl
from jax.experimental.pallas import tpu as pltpu


def _round_up(x, m):
    return ((x + m - 1) // m) * m


def _cdiv(a, b):
    return -(-a // b)


# ----------------------------------------------------------------------------
# Pallas kernel: feature-major 3-layer MLP (Linear->relu->Linear->relu->Linear)
#   x_ref  : (F_aug, TILE_M) bf16   feature-major rows; LAST row is all-ones
#                                   (layer-1 bias folded into the matmul)
#   w1_ref : (H1, F_aug)     bf16   torch layout (out, in) + bias column
#   w2_ref : (H2, H1)        bf16
#   b2_ref : (H2, 1)         f32
#   w3_ref : (1, H2)         f32    layer 3 rides the MXU (extended-slot slack)
#   b3_ref : (1, 1)          f32
#   o_ref  : (1, TILE_M)     f32    lane-dense output
# ----------------------------------------------------------------------------
def _policy_mlp_kernel(x_ref, w1_ref, w2_ref, b2_ref, w3_ref, b3_ref, o_ref):
    # Layer 1: bf16 MXU matmul, f32 accumulation.  Bias is already folded into
    # the matmul via the ones row, so the epilogue is just relu + downcast.
    # (relu commutes with the bf16 downcast, so f32-relu-then-cast is
    #  numerically identical to a bf16 relu; the f32 order is also safe on v5e,
    #  which has no bf16 VALU.)
    h1 = jnp.dot(w1_ref[...], x_ref[...], preferred_element_type=jnp.float32)
    h1 = jnp.maximum(h1, 0.0).astype(jnp.bfloat16)                # (H1, TILE_M)
    # Layer 2: bf16 MXU matmul, f32 accumulation; bias + relu on the VPU in f32.
    h2 = jnp.dot(w2_ref[...], h1,
                 preferred_element_type=jnp.float32) + b2_ref[...]
    h2 = jnp.maximum(h2, 0.0)                                     # (H2, TILE_M)
    # Layer 3 (H2 -> 1): (1,H2)x(H2,TILE_M) MXU matmul.  Once step overhead is
    # amortised the VALU is the binding slot; the MXU has slack here.
    o_ref[...] = jnp.dot(w3_ref[...], h2,
                         preferred_element_type=jnp.float32) + b3_ref[...]


def policy_mlp_pallas(xT, params, *, tile_m):
    """xT: (F_aug, M_pad) bf16 with M_pad % tile_m == 0. Returns (1, M_pad) f32."""
    f_aug, m_pad = xT.shape
    h1 = params["w1a"].shape[0]
    h2 = params["w2t"].shape[0]
    assert m_pad % tile_m == 0
    grid = (m_pad // tile_m,)

    const = lambda i: (0, 0)
    flops = 2 * m_pad * (f_aug * h1 + h1 * h2 + h2)
    bytes_accessed = (int(xT.size) * xT.dtype.itemsize           # streamed input
                      + m_pad * 4                                # f32 output
                      + sum(int(v.size) * v.dtype.itemsize
                            for v in params.values()))           # resident weights

    return pl.pallas_call(
        _policy_mlp_kernel,
        out_shape=jax.ShapeDtypeStruct((1, m_pad), jnp.float32),
        grid_spec=pltpu.PrefetchScalarGridSpec(
            num_scalar_prefetch=0,
            grid=grid,
            in_specs=[
                pl.BlockSpec((f_aug, tile_m), lambda i: (0, i)),   # streamed rows
                pl.BlockSpec((h1, f_aug), const),                  # VMEM-resident
                pl.BlockSpec((h2, h1), const),
                pl.BlockSpec((h2, 1), const),
                pl.BlockSpec((1, h2), const),
                pl.BlockSpec((1, 1), const),
            ],
            out_specs=pl.BlockSpec((1, tile_m), lambda i: (0, i)),
        ),
        compiler_params=pltpu.CompilerParams(
            dimension_semantics=("parallel",),   # v7x: shard row tiles over 2 TCs
            vmem_limit_bytes=32 * 1024 * 1024,   # headroom on v5e (16 MiB default)
        ),
        cost_estimate=pl.CostEstimate(
            flops=int(flops), transcendentals=0,
            bytes_accessed=int(bytes_accessed)),
    )(xT, params["w1a"], params["w2t"], params["b2"], params["w3t"],
      params["b3"])


# ----------------------------------------------------------------------------
# Parameter init (matches iclr2020_NeuralAF.init_weights: W ~ N(0, 0.01), b = 0).
# torch nn.Linear stores weight as (out, in); we keep that layout and pack it
# for the feature-major kernel (layer-1 bias folded as an extra weight column).
# ----------------------------------------------------------------------------
def init_torch_mlp_params(key, dims, std=0.01):
    params = []
    for i in range(len(dims) - 1):
        key, sub = jax.random.split(key)
        w = std * jax.random.normal(sub, (dims[i + 1], dims[i]), jnp.float32)
        params.append((w, jnp.zeros((dims[i + 1],), jnp.float32)))
    return params, key


def pack_policy_params(torch_params):
    """Feature-major packing for the Pallas kernel (weights stay (out, in))."""
    (w1, b1), (w2, b2), (w3, b3) = torch_params
    assert w3.shape[0] == 1
    w1_aug = jnp.concatenate([w1, b1.reshape(-1, 1)], axis=1)   # bias -> column
    return {
        "w1a": w1_aug.astype(jnp.bfloat16),    # (H1, F_pol+1) bf16, bias folded
        "w2t": w2.astype(jnp.bfloat16),        # (H2, H1) bf16
        "b2": b2.reshape(-1, 1),               # (H2, 1) f32
        "w3t": w3,                             # (1, H2) f32 (torch layout)
        "b3": b3.reshape(1, 1),                # (1, 1) f32
    }


def to_xw_params(torch_params):
    """(in, out)-layout params for the plain-JAX value MLP (x @ W + b)."""
    return [(w.T, b.reshape(1, -1)) for (w, b) in torch_params]


def _mlp_ref(x, xw_params):
    """Plain-JAX relu MLP over (in, out)-layout params."""
    n = len(xw_params)
    for i, (w, b) in enumerate(xw_params):
        x = x @ w + b
        if i < n - 1:
            x = jnp.maximum(x, 0.0)
    return x


def _static_feature_parts(states, keep_cols):
    """Static contiguous slices covering states[:, :, keep_cols] (no gather)."""
    keep_cols = list(keep_cols)
    assert all(a < b for a, b in zip(keep_cols, keep_cols[1:])), \
        "keep_cols must be strictly increasing"
    runs, start, prev = [], None, None
    for c in keep_cols:
        if start is None:
            start, prev = c, c
        elif c == prev + 1:
            prev = c
        else:
            runs.append((start, prev + 1))
            start, prev = c, c
    runs.append((start, prev + 1))
    return [lax.slice_in_dim(states, s, e, axis=2) for (s, e) in runs]


# ----------------------------------------------------------------------------
# NeuralAF forward: static feature masking + layout plumbing (plain JAX glue);
# the policy-MLP hot path runs in the Pallas kernel.
# ----------------------------------------------------------------------------
@functools.partial(
    jax.jit,
    static_argnames=("t_idx", "T_idx", "exclude_t_from_policy",
                     "exclude_T_from_policy", "use_value_network",
                     "tile_m_max"))
def neural_af_forward(states, policy_params, value_params, *, t_idx, T_idx,
                      exclude_t_from_policy=True, exclude_T_from_policy=True,
                      use_value_network=True, tile_m_max=16384):
    assert states.ndim == 3
    assert tile_m_max % 128 == 0
    B, T, F = states.shape

    keep = [i for i in range(F)
            if not ((exclude_t_from_policy and i == t_idx) or
                    (exclude_T_from_policy and i == T_idx))]
    f_pol = len(keep)
    f_aug = f_pol + 1                      # + ones column (folded layer-1 bias)
    M = B * T

    # Balanced tiles (minimal padding), >=2 and an EVEN number of grid steps so
    # v7x's two TensorCores both get work; tile_m <= tile_m_max keeps
    # intermediates well inside the scoped-VMEM budget on every generation.
    n_tiles = max(2, _cdiv(M, tile_m_max))
    n_tiles += n_tiles % 2
    tile_m = _round_up(_cdiv(M, n_tiles), 128)
    m_pad = n_tiles * tile_m

    # One fused slab build: static slices + ones column in a single concatenate,
    # cast at the concatenate, pad rows BEFORE the transpose so XLA can fold
    # cast/pad/transpose into one copy of the input slab.
    parts = _static_feature_parts(states, keep)
    parts.append(jnp.ones((B, T, 1), states.dtype))
    x_aug = jnp.concatenate(parts, axis=2).astype(jnp.bfloat16)   # (B,T,F_aug)
    x2d = x_aug.reshape(M, f_aug)
    if m_pad != M:
        x2d = jnp.pad(x2d, ((0, m_pad - M), (0, 0)))
    xT = x2d.T                                                    # (F_aug,m_pad)

    logits = policy_mlp_pallas(xT, policy_params, tile_m=tile_m)
    # Padded columns carry garbage logits; this [:M] slice must stay coupled to
    # any tile_m / m_pad change.
    logits = logits.reshape(m_pad)[:M].reshape(B, T)

    if use_value_network:
        # states[:, [0], [t_idx, T_idx]] -> (B, 2); static scalar indices.
        tT = jnp.stack([states[:, 0, t_idx], states[:, 0, T_idx]], axis=-1)
        # Tiny (B,2)->(B,) MLP: plain JAX (a second pallas launch costs more
        # than the math itself).
        values = _mlp_ref(tT, value_params).reshape(B)
    else:
        values = jnp.zeros((B,), jnp.float32)
    return logits, values


# Pure-JAX reference for the policy net that mirrors the kernel's bf16
# input/weight quantization (incl. the folded, bf16-quantized layer-1 bias)
# but accumulates in exact f32.
def _policy_ref(x_rows, torch_params):
    (w1, b1), (w2, b2), (w3, b3) = torch_params
    bf = lambda a: a.astype(jnp.bfloat16).astype(jnp.float32)
    hp = lax.Precision.HIGHEST
    h1 = jnp.maximum(jnp.dot(bf(x_rows), bf(w1).T, precision=hp) + bf(b1), 0.0)
    h2 = jnp.maximum(jnp.dot(bf(h1), bf(w2).T, precision=hp) + b2, 0.0)
    return jnp.dot(h2, w3.T, precision=hp) + b3


if __name__ == "__main__":
    # Config consistent with the module's options:
    #   observation_space.shape = (T, 6); arch_spec = arch_spec_value = [32, 32];
    #   activations='relu'; exclude_t/T_from_policy=True, t_idx=4, T_idx=5;
    #   use_value_network=True.
    B, T, F = 2, 8, 6
    t_idx, T_idx = 4, 5
    arch_spec = [32, 32]
    arch_spec_value = [32, 32]
    f_pol = F - 2

    key = jax.random.PRNGKey(0)
    policy_torch, key = init_torch_mlp_params(key, [f_pol] + arch_spec + [1])
    value_torch, key = init_torch_mlp_params(key, [2] + arch_spec_value + [1])
    policy_params = pack_policy_params(policy_torch)
    value_params = to_xw_params(value_torch)

    key, sub = jax.random.split(key)
    states = jax.random.normal(sub, (B, T, F), jnp.float32)

    logits, values = neural_af_forward(
        states, policy_params, value_params,
        t_idx=t_idx, T_idx=T_idx,
        exclude_t_from_policy=True, exclude_T_from_policy=True,
        use_value_network=True)
    logits = jax.block_until_ready(logits)
    values = jax.block_until_ready(values)

    # --- correctness check against pure-JAX references ----------------------
    keep = [i for i in range(F) if i not in (t_idx, T_idx)]
    x_rows = jnp.concatenate(_static_feature_parts(states, keep),
                             axis=2).reshape(B * T, f_pol)
    ref_logits = _policy_ref(x_rows, policy_torch).reshape(B, T)
    tT = jnp.stack([states[:, 0, t_idx], states[:, 0, T_idx]], axis=-1)
    ref_values = _mlp_ref(tT, value_params).reshape(B)

    assert logits.shape == (B, T) and values.shape == (B,)
    assert jnp.allclose(logits, ref_logits, rtol=1e-2, atol=1e-7), (
        float(jnp.max(jnp.abs(logits - ref_logits))))
    assert jnp.allclose(values, ref_values, rtol=1e-3, atol=1e-7), (
        float(jnp.max(jnp.abs(values - ref_values))))

    print("KERNEL_OK")
</pallas_src>

<mosaic_0001>
module attributes {stable_mosaic.version = 11 : i64} {
  func.func @_policy_mlp_kernel(%arg0: i32, %arg1: memref<5x128xbf16, #tpu.memory_space<vmem>>, %arg2: memref<32x5xbf16, #tpu.memory_space<vmem>>, %arg3: memref<32x32xbf16, #tpu.memory_space<vmem>>, %arg4: memref<32x1xf32, #tpu.memory_space<vmem>>, %arg5: memref<1x32xf32, #tpu.memory_space<vmem>>, %arg6: memref<1x1xf32, #tpu.memory_space<vmem>>, %arg7: memref<1x128xf32, #tpu.memory_space<vmem>>) attributes {dimension_semantics = [#tpu.dimension_semantics<parallel>], iteration_bounds = array<i64: 2>, scalar_prefetch = 0 : i64, scratch_operands = 0 : i64, tpu.core_type = #tpu.core_type<tc>, window_params = [{transform_indices = @transform_0, window_bounds = array<i64: 5, 128>}, {pipeline_mode = #tpu.pipeline_mode<synchronous>, transform_indices = @transform_1, window_bounds = array<i64: 32, 5>}, {pipeline_mode = #tpu.pipeline_mode<synchronous>, transform_indices = @transform_2, window_bounds = array<i64: 32, 32>}, {pipeline_mode = #tpu.pipeline_mode<synchronous>, transform_indices = @transform_3, window_bounds = array<i64: 32, 1>}, {pipeline_mode = #tpu.pipeline_mode<synchronous>, transform_indices = @transform_4, window_bounds = array<i64: 1, 32>}, {pipeline_mode = #tpu.pipeline_mode<synchronous>, transform_indices = @transform_5, window_bounds = array<i64: 1, 1>}, {transform_indices = @transform_6, window_bounds = array<i64: 1, 128>}]} {
    %c0 = arith.constant 0 : index
    %c0_0 = arith.constant 0 : index
    %0 = vector.load %arg2[%c0, %c0_0] : memref<32x5xbf16, #tpu.memory_space<vmem>>, vector<32x5xbf16>
    %c0_1 = arith.constant 0 : index
    %c0_2 = arith.constant 0 : index
    %1 = vector.load %arg1[%c0_1, %c0_2] : memref<5x128xbf16, #tpu.memory_space<vmem>>, vector<5x128xbf16>
    %cst = arith.constant dense<0.000000e+00> : vector<32x128xf32>
    %2 = tpu.matmul %0, %1, %cst {dimension_numbers = #tpu.dot_dimension_numbers<[1], [0], [0], [1], [0, 0, 1, 1], [], []>} : vector<32x5xbf16>, vector<5x128xbf16>, vector<32x128xf32> -> vector<32x128xf32>
    %cst_3 = arith.constant 0.000000e+00 : f32
    %3 = vector.broadcast %cst_3 : f32 to vector<32x128xf32>
    %4 = arith.maximumf %2, %3 : vector<32x128xf32>
    %5 = arith.truncf %4 : vector<32x128xf32> to vector<32x128xbf16>
    %c0_4 = arith.constant 0 : index
    %c0_5 = arith.constant 0 : index
    %6 = vector.load %arg3[%c0_4, %c0_5] : memref<32x32xbf16, #tpu.memory_space<vmem>>, vector<32x32xbf16>
    %cst_6 = arith.constant dense<0.000000e+00> : vector<32x128xf32>
    %7 = tpu.matmul %6, %5, %cst_6 {dimension_numbers = #tpu.dot_dimension_numbers<[1], [0], [0], [1], [0, 0, 1, 1], [], []>} : vector<32x32xbf16>, vector<32x128xbf16>, vector<32x128xf32> -> vector<32x128xf32>
    %c0_7 = arith.constant 0 : index
    %c0_8 = arith.constant 0 : index
    %8 = vector.load %arg4[%c0_7, %c0_8] : memref<32x1xf32, #tpu.memory_space<vmem>>, vector<32x1xf32>
    %9 = vector.broadcast %8 : vector<32x1xf32> to vector<32x128xf32>
    %10 = arith.addf %7, %9 : vector<32x128xf32>
    %cst_9 = arith.constant 0.000000e+00 : f32
    %11 = vector.broadcast %cst_9 : f32 to vector<32x128xf32>
    %12 = arith.maximumf %10, %11 : vector<32x128xf32>
    %c0_10 = arith.constant 0 : index
    %c0_11 = arith.constant 0 : index
    %13 = vector.load %arg5[%c0_10, %c0_11] : memref<1x32xf32, #tpu.memory_space<vmem>>, vector<1x32xf32>
    %cst_12 = arith.constant dense<0.000000e+00> : vector<1x128xf32>
    %14 = tpu.matmul %13, %12, %cst_12 {dimension_numbers = #tpu.dot_dimension_numbers<[1], [0], [0], [1], [0, 0, 1, 1], [], []>} : vector<1x32xf32>, vector<32x128xf32>, vector<1x128xf32> -> vector<1x128xf32>
    %c0_13 = arith.constant 0 : index
    %c0_14 = arith.constant 0 : index
    %15 = vector.load %arg6[%c0_13, %c0_14] : memref<1x1xf32, #tpu.memory_space<vmem>>, vector<1x1xf32>
    %16 = vector.broadcast %15 : vector<1x1xf32> to vector<1x128xf32>
    %17 = arith.addf %14, %16 : vector<1x128xf32>
    %c0_15 = arith.constant 0 : index
    %c0_16 = arith.constant 0 : index
    %18 = vector.load %arg7[%c0_15, %c0_16] : memref<1x128xf32, #tpu.memory_space<vmem>>, vector<1x128xf32>
    tpu.vector_store %arg7[%c0_15, %c0_16], %17 {strides = array<i32>} : memref<1x128xf32, #tpu.memory_space<vmem>>, vector<1x128xf32>,
    return
  }
  func.func @transform_0(%arg0: i32) -> (i32, i32) {
    %c0_i32 = arith.constant 0 : i32
    %c0_i32_0 = arith.constant 0 : i32
    return %c0_i32, %arg0 : i32, i32
  }
  func.func @transform_1(%arg0: i32) -> (i32, i32) {
    %c0_i32 = arith.constant 0 : i32
    %c0_i32_0 = arith.constant 0 : i32
    %c0_i32_1 = arith.constant 0 : i32
    return %c0_i32, %c0_i32_0 : i32, i32
  }
  func.func @transform_2(%arg0: i32) -> (i32, i32) {
    %c0_i32 = arith.constant 0 : i32
    %c0_i32_0 = arith.constant 0 : i32
    %c0_i32_1 = arith.constant 0 : i32
    return %c0_i32, %c0_i32_0 : i32, i32
  }
  func.func @transform_3(%arg0: i32) -> (i32, i32) {
    %c0_i32 = arith.constant 0 : i32
    %c0_i32_0 = arith.constant 0 : i32
    %c0_i32_1 = arith.constant 0 : i32
    return %c0_i32, %c0_i32_0 : i32, i32
  }
  func.func @transform_4(%arg0: i32) -> (i32, i32) {
    %c0_i32 = arith.constant 0 : i32
    %c0_i32_0 = arith.constant 0 : i32
    %c0_i32_1 = arith.constant 0 : i32
    return %c0_i32, %c0_i32_0 : i32, i32
  }
  func.func @transform_5(%arg0: i32) -> (i32, i32) {
    %c0_i32 = arith.constant 0 : i32
    %c0_i32_0 = arith.constant 0 : i32
    %c0_i32_1 = arith.constant 0 : i32
    return %c0_i32, %c0_i32_0 : i32, i32
  }
  func.func @transform_6(%arg0: i32) -> (i32, i32) {
    %c0_i32 = arith.constant 0 : i32
    %c0_i32_0 = arith.constant 0 : i32
    return %c0_i32, %arg0 : i32, i32
  }
}

</mosaic_0001>

<bundles_post_ra>
// kernel: neural_af_forward.1
= control target key start
LH: loop header
LB: loop body
LE: loop exit
PB: predicated region body
PF: predicated region fallthrough
CT: control target
= control target key end

     0   :  { %s546_s23 = smov 0   ;;  %s597_s0 = inlined_call_operand.vmem [shape: bf16[5,256], index: 0, kind: input, shape index: {}]   ;;  %s598_s1 = inlined_call_operand.vmem [shape: bf16[32,5], index: 1, kind: input, shape index: {}]   ;;  %s599_s2 = inlined_call_operand.vmem [shape: bf16[32,32], index: 2, kind: input, shape index: {}]   ;;  %s600_s3 = inlined_call_operand.vmem [shape: f32[32,1], index: 3, kind: input, shape index: {}]   ;;  %s601_s4 = inlined_call_operand.vmem [shape: f32[1,32], index: 4, kind: input, shape index: {}]   ;;  %s602_s5 = inlined_call_operand.<no memory space> [shape: f32[1,1], index: 5, kind: input, shape index: {}]   ;;  %s603_s6 = inlined_call_operand.vmem [shape: f32[1,256], index: 6, kind: output, shape index: {}]  }
   0x1   :  { %v11_v0 = vstv %s602_s5 }
   0x2   :  { %12 = vst [vmem:[#allocation2] sm:$0x1] %v11_v0 }
   0x3 LB: > { %s449_s24 = sadd.s32 4294967295, %s504_s23   ;;  %p453_p0 = scmp.ge.s32.totalorder %s504_s23, 1  ;;  %s504_s23 = sphi %s546_s23, %s18_s23  }
   0x4   : > { %p213_p1 = scmp.lt.s32.totalorder %s504_s23, 3 }
   0x6   : > { %p214_p2 = pnand %p453_p0, %p213_p1 }
   0x7   : > { %p240_p3 = scmp.lt.s32.totalorder (!%p214_p2), %s449_s24, 1 }
   0x8   : > { %217 = sbr.rel (%p214_p2) target bundleno = 459 (0x1cb), region = 44 }
   0xd   : > { %vm270_vm0 = vcmask 1041408   ;;  %vm271_vm1 = vcmask 1042432   ;;  %v506_v1 = vmov 65535   ;;  %s605_s24 = smov (!%p240_p3, %s449_s24), 1  ;;  %v479_v6 = vld [vmem:[%s598_s1 + $0x8] sm:$0xff]  ;;  %v478_v7 = vld [vmem:[%s598_s1] sm:$0xff] }
   0xe   : > { %v272_v2 = vsel %vm270_vm0, 4294967295, %v506_v1  ;;  %s454_s5 = sshll.u32 %s605_s24, 2  ;;  %vm263_vm2 = vcmask 39936   ;;  %v309_v8 = vld [vmem:[%s600_s3 + $0x18] sm:$0xff]  ;;  %v507_v9 = vmov 0   ;;  %v307_v10 = vld [vmem:[%s600_s3 + $0x8] sm:$0xff]  ;;  %s246_s25 = scalar_lea.vmem %s603_s6, %s605_s24 }
   0xf   : > { %v273_v3 = vsel %vm271_vm1, %v272_v2, 0  ;;  %s243_s27 = scalar_lea.vmem %s597_s0, %s454_s5  ;;  %495 = vset.pattern.permute.xlu0 %v507_v9  ;;  %496 = vset.pattern.permute.xlu1 %v507_v9  ;;  %v308_v11 = vld [vmem:[%s600_s3 + $0x10] sm:$0xff]  ;;  %v306_v12 = vld [vmem:[%s600_s3] sm:$0xff]  ;;  %v481_v23 = vld [vmem:[%s599_s2 + $0x8] sm:$0xff]  ;;  %vm340_vm3 = vcmask 261120  }
  0x10   : > { %v252_v4 = vld [vmem:[%s243_s27] sm:$0x7]  ;;  %327 = vperm.xlu0 %495, %v309_v8   ;;  %317 = vperm.xlu1 %496, %v307_v10  }
  0x11   : > { %v275_v5 = vand.u32 %v273_v3, %v252_v4  ;;  %497 = vset.pattern.permute.xlu2 %v507_v9  ;;  %v480_v24 = vld [vmem:[%s599_s2] sm:$0xff] }
  0x12   : > { %v371_v25 = vld [vmem:[#allocation2] sm:$0x1] }
  0x13   : > { %482 = vmatpush.bf16.msra.mxu2 %v275_v5  ;;  %284 = vmatpush.bf16.msra.mxu0 %v275_v5  ;;  %v370_v42 = vld [vmem:[%s601_s4] sm:$0x1] }
  0x14   : > { %374 = vperm.xlu2 %497, %v371_v25  }
  0x16   : > { %464 = vmatmul.msk.bf16.vlgmr.msra.gmra.mxu2 %vm263_vm2, %v479_v6  ;;  %463 = vmatmul.msk.bf16.vlgmr.msra.gmra.mxu0 %vm263_vm2, %v478_v7 }
  0x18   : > { %322 = vperm.xlu0 %495, %v308_v11   ;;  %312 = vperm.xlu1 %496, %v306_v12  }
  0x6e   : > { %v375_v43 = vpop.permute.xlu2 %374 }
  0x6f   : > { %v377_v44 = vperm.slane %v375_v43, 0 }
  0x82   : > { %v328_v26 = vpop.permute.xlu0 %327  ;;  %v318_v28 = vpop.permute.xlu1 %317 }
  0x8a   : > { %v323_v30 = vpop.permute.xlu0 %322  ;;  %v313_v35 = vpop.permute.xlu1 %312 }
  0x93   : > { %v286_v13 = vpop.f32.mrf.mxu0 }
  0x94   : > { %v296_v19 = vmax.f32 %v286_v13, 0.0 }
  0x99   : > { %v291_v14 = vpop.f32.mrf.mxu2 }
  0x9a   : > { %v298_v17 = vmax.f32 %v291_v14, 0.0 }
  0x9b   : > { %v288_v15 = vpop.f32.mrf.mxu0 }
  0x9c   : > { %v297_v20 = vmax.f32 %v288_v15, 0.0 }
  0x9e   : > { %v300_v22 = vpack.c.bf16 %v297_v20, %v296_v19 }
  0xa1   : > { %v293_v16 = vpop.f32.mrf.mxu2 }
  0xa2   : > { %v299_v18 = vmax.f32 %v293_v16, 0.0 }
  0xa4   : > { %v301_v21 = vpack.c.bf16 %v299_v18, %v298_v17 }
  0xa6   : > { %353 = vmatpush.bf16.msra.mxu1 %v301_v21  ;;  %483 = vmatpush.bf16.msra.mxu3 %v301_v21 }
  0xaa   : > { %354 = vmatpush.bf16.msra.mxu1 %v300_v22  ;;  %484 = vmatpush.bf16.msra.mxu3 %v300_v22 }
  0xad   : > { %474 = vmatmul.msk.bf16.vlgmr.msra.gmra.mxu3 %vm340_vm3, %v481_v23  ;;  %473 = vmatmul.msk.bf16.vlgmr.msra.gmra.mxu1 %vm340_vm3, %v480_v24 }
 0x12a   : > { %v356_v27 = vpop.f32.mrf.mxu1 }
 0x12b   : > { %v357_v39 = vadd.f32 %v356_v27, %v313_v35 }
 0x12d   : > { %v366_v41 = vmax.f32 %v357_v39, 0.0 }
 0x130   : > { %v361_v29 = vpop.f32.mrf.mxu3 }
 0x131   : > { %v362_v33 = vadd.f32 %v361_v29, %v323_v30 }
 0x132   : > { %v358_v31 = vpop.f32.mrf.mxu1 }
 0x133   : > { %v359_v36 = vadd.f32 %v358_v31, %v318_v28  ;;  %v368_v38 = vmax.f32 %v362_v33, 0.0 }
 0x135   : > { %v367_v40 = vmax.f32 %v359_v36, 0.0 }
 0x138   : > { %v363_v32 = vpop.f32.mrf.mxu3 }
 0x139   : > { %v364_v34 = vadd.f32 %v363_v32, %v328_v26 }
 0x13b   : > { %v369_v37 = vmax.f32 %v364_v34, 0.0 }
 0x13d   : > { %393 = vmatpush.msrb.mxu2 %v369_v37 }
 0x13f   : > { %394 = vmatpush.msrb.mxu2 %v368_v38 }
 0x141   : > { %395 = vmatpush.msrb.mxu2 %v367_v40 }
 0x143   : > { %396 = vmatpush.msrb.mxu2 %v366_v41 }
 0x144   : > { %475 = vmatmul.msk.f32.vlgmr.msrb.gmra.mxu2 %vm340_vm3, %v370_v42 }
 0x1c7   : > { %v398_v45 = vpop.f32.mrf.mxu2 }
 0x1c8   : > { %v399_v46 = vadd.f32 %v398_v45, %v377_v44 }
 0x1ca   : > { %401 = vst [vmem:[%s246_s25] sm:$0x1] %v399_v46 }
 0x1cb PF: > { %s18_s23 = sadd.s32 1, %s504_s23  }
 0x1cc   : > { %p15_p4 = scmp.ge.s32.totalorder %s18_s23, 4  }
 0x1ce   :  { %17 = sbr.rel (!%p15_p4) target bundleno = 3 (0x3), region = 74 }

</bundles_post_ra>
